<compile_context>
chip_gen: v7x
topology: tpu7x:2x2x1
jax: 0.10.0
libtpu: 0.0.40
codegen_flags: <defaults>
</compile_context>

<pallas_src>
import functools

import jax
import jax.numpy as jnp
from jax.experimental import pallas as pl
from jax.experimental.pallas import tpu as pltpu

_LANES = 128
_MAX_TILE_ROWS = 1024   # 1024x128 f32 = 512 KiB/channel/block; fits all gens
_MAX_PACK = 8           # cap on images packed per grid step (static unroll)


def _color_jitter_kernel(factors_ref, x_ref, o_ref, *, images_per_block):
    """factors_ref: SMEM (4, B) f32 rows = [brightness, contrast, saturation, hue(rad)].
    x_ref / o_ref : VMEM (G, 3, TR, 128) lane-dense pixel tiles of G images."""
    bblk = pl.program_id(0)
    for g in range(images_per_block):              # small static unroll
        b = bblk * images_per_block + g
        bf = factors_ref[0, b]
        cf = factors_ref[1, b]
        sf = factors_ref[2, b]
        hf = factors_ref[3, b]

        # --- brightness + contrast fused into one clip (valid since cf >= 0):
        #     clip(clip(x+bf,0,1)*cf, 0, 1) == clip((x+bf)*cf, 0, min(cf,1))
        hi = jnp.minimum(cf, jnp.float32(1.0))
        slab = x_ref[g].astype(jnp.float32)        # (3, TR, 128)
        slab = jnp.clip((slab + bf) * cf, 0.0, hi)

        r, gc, bl = slab[0], slab[1], slab[2]

        # --- RGB -> HSV ---
        maxc = jnp.maximum(jnp.maximum(r, gc), bl)
        minc = jnp.minimum(jnp.minimum(r, gc), bl)
        delta = maxc - minc
        v = maxc

        inv_max = pl.reciprocal(jnp.maximum(maxc, jnp.float32(1e-8)), approx=True)
        s = delta * inv_max                        # maxc==0 -> delta==0 -> s==0

        # NOTE: approx reciprocal adds ~1e-3 relative hue error on near-gray
        # pixels (tiny delta); outputs still land in [0,1].
        safe_delta = jnp.where(delta > 0.0, delta, 1.0)
        inv_delta = pl.reciprocal(safe_delta, approx=True)

        is_r = maxc == r
        is_g = maxc == gc
        num = jnp.where(is_r, gc - bl, jnp.where(is_g, bl - r, r - gc))
        off = jnp.where(is_r, 0.0, jnp.where(is_g, 2.0, 4.0))
        h6 = num * inv_delta + off                 # sextants in (-1, 5]; gray -> 0

        # --- saturation ---
        s = jnp.clip(s * sf, 0.0, 1.0)

        # --- hue shift (hf radians, |hf| <= pi) without jnp.mod ---
        h6 = h6 + hf * jnp.float32(3.0 / jnp.pi)   # now in (-4, 8]
        h6 = jnp.where(h6 < 0.0, h6 + 6.0, h6)
        h6 = jnp.where(h6 >= 6.0, h6 - 6.0, h6)    # back to [0, 6)

        # --- HSV -> RGB (k-formula; mod replaced by one conditional wrap) ---
        vs = v * s

        def channel(n):
            k = h6 + jnp.float32(n)                # in [n, n+6)
            k = jnp.where(k >= 6.0, k - 6.0, k)    # in [0, 6)
            return v - vs * jnp.clip(jnp.minimum(k, 4.0 - k), 0.0, 1.0)

        o_ref[g, 0] = channel(5.0).astype(o_ref.dtype)
        o_ref[g, 1] = channel(3.0).astype(o_ref.dtype)
        o_ref[g, 2] = channel(1.0).astype(o_ref.dtype)


def _round_up(x, m):
    return ((x + m - 1) // m) * m


def _cdiv(a, b):
    return -(-a // b)


@jax.jit
def color_jitter(x, factors):
    """x: (B, 3, H, W) float32 in [0,1].  factors: (4, B) float32."""
    B, C, H, W = x.shape
    assert C == 3, "ColorJitter expects RGB (C=3) images"
    hw = H * W

    rows = _cdiv(hw, _LANES)
    n_tiles = _cdiv(rows, _MAX_TILE_ROWS)
    tile_rows = _round_up(_cdiv(rows, n_tiles), 8)   # <= 7 rows of padding

    # Small-image fast path: pack G images per grid step to amortize the
    # ~0.35 us per-step overhead, but keep >= 2 batch steps when B >= 2 so
    # both v7x TensorCores get work.
    G = 1
    if n_tiles == 1 and B > 1:
        max_pack = min(_MAX_PACK,
                       max(1, _MAX_TILE_ROWS // tile_rows),
                       max(1, B // 2))
        for g in range(min(B, max_pack), 0, -1):
            if B % g == 0:
                G = g
                break

    # If the whole problem would be a single grid step, split the pixel axis
    # (only when each half still has >= 8 rows) so both v7x TCs get work.
    if B // G == 1 and n_tiles == 1 and tile_rows >= 16:
        n_tiles = 2
        tile_rows = _round_up(_cdiv(rows, 2), 8)

    padded_rows = n_tiles * tile_rows
    hw_pad = padded_rows * _LANES

    # TODO(synk): when H*W is not a multiple of 128, the pad + trailing slice
    # each cost one extra HBM pass; an in-kernel ragged-tail mask would avoid it.
    x_flat = x.reshape(B, C, hw)
    if hw_pad != hw:
        x_flat = jnp.pad(x_flat, ((0, 0), (0, 0), (0, hw_pad - hw)))
    x_tiled = x_flat.reshape(B, C, padded_rows, _LANES)

    kernel = functools.partial(_color_jitter_kernel, images_per_block=G)
    out = pl.pallas_call(
        kernel,
        out_shape=jax.ShapeDtypeStruct((B, C, padded_rows, _LANES), x.dtype),
        grid_spec=pltpu.PrefetchScalarGridSpec(
            num_scalar_prefetch=1,
            grid=(B // G, n_tiles),
            in_specs=[pl.BlockSpec((G, C, tile_rows, _LANES),
                                   lambda b, t, f: (b, 0, t, 0))],
            out_specs=pl.BlockSpec((G, C, tile_rows, _LANES),
                                   lambda b, t, f: (b, 0, t, 0)),
        ),
        compiler_params=pltpu.CompilerParams(
            dimension_semantics=("parallel", "parallel"),
            vmem_limit_bytes=32 * 1024 * 1024),
        cost_estimate=pl.CostEstimate(
            flops=int(60 * B * hw_pad),
            transcendentals=int(2 * B * hw_pad),
            bytes_accessed=int(2 * B * C * hw_pad * 4)),
    )(factors, x_tiled)

    out = out.reshape(B, C, hw_pad)
    if hw_pad != hw:
        out = out[:, :, :hw]
    return out.reshape(B, C, H, W)


def make_jitter_params(key, batch_size, brightness, contrast, saturation, hue):
    """Deterministic stand-in for kornia pg._random_color_jitter_gen.
    Returns (4, B) f32: rows = [brightness, contrast, saturation, hue(rad)]."""
    kb, kc, ks, kh = jax.random.split(key, 4)
    bf = jax.random.uniform(kb, (batch_size,), jnp.float32,
                            -brightness, brightness)
    cf = jax.random.uniform(kc, (batch_size,), jnp.float32,
                            max(0.0, 1.0 - contrast), 1.0 + contrast)
    sf = jax.random.uniform(ks, (batch_size,), jnp.float32,
                            max(0.0, 1.0 - saturation), 1.0 + saturation)
    hf = jax.random.uniform(kh, (batch_size,), jnp.float32, -hue, hue)
    return jnp.stack([bf, cf, sf, hf], axis=0)  # (4, B) — long axis last (SMEM)


if __name__ == "__main__":
    key = jax.random.PRNGKey(0)
    k_img, k_par = jax.random.split(key)

    B, C, H, W = 2, 3, 16, 16
    x = jax.random.uniform(k_img, (B, C, H, W), jnp.float32, 0.0, 1.0)

    # ColorJitter(brightness=0.2, contrast=0.3, saturation=0.4, hue=0.1 rad)
    factors = make_jitter_params(k_par, B, brightness=0.2, contrast=0.3,
                                 saturation=0.4, hue=0.1)

    out = color_jitter(x, factors)
    jax.block_until_ready(out)

    assert out.shape == (B, C, H, W) and out.dtype == jnp.float32
    assert bool(jnp.all(jnp.isfinite(out)))
    assert bool(jnp.all((out >= 0.0) & (out <= 1.0)))
    print("KERNEL_OK")
</pallas_src>

<mosaic_0001>
module attributes {stable_mosaic.version = 11 : i64} {
  func.func @_color_jitter_kernel(%arg0: i32, %arg1: i32, %arg2: memref<4x2xf32, #tpu.memory_space<smem>>, %arg3: memref<1x3x8x128xf32, #tpu.memory_space<vmem>>, %arg4: memref<1x3x8x128xf32, #tpu.memory_space<vmem>>) attributes {dimension_semantics = [#tpu.dimension_semantics<parallel>, #tpu.dimension_semantics<parallel>], iteration_bounds = array<i64: 2, 1>, scalar_prefetch = 1 : i64, scratch_operands = 0 : i64, tpu.core_type = #tpu.core_type<tc>, window_params = [{transform_indices = @transform_0, window_bounds = array<i64: 1, 3, 8, 128>}, {transform_indices = @transform_1, window_bounds = array<i64: 1, 3, 8, 128>}]} {
    %c1_i32 = arith.constant 1 : i32
    %0 = arith.muli %arg0, %c1_i32 : i32
    %c0_i32 = arith.constant 0 : i32
    %1 = arith.addi %0, %c0_i32 : i32
    %c0 = arith.constant 0 : index
    %2 = arith.index_cast %1 : i32 to index
    %3 = memref.load %arg2[%c0, %2] : memref<4x2xf32, #tpu.memory_space<smem>>
    %c1 = arith.constant 1 : index
    %4 = arith.index_cast %1 : i32 to index
    %5 = memref.load %arg2[%c1, %4] : memref<4x2xf32, #tpu.memory_space<smem>>
    %c2 = arith.constant 2 : index
    %6 = arith.index_cast %1 : i32 to index
    %7 = memref.load %arg2[%c2, %6] : memref<4x2xf32, #tpu.memory_space<smem>>
    %c3 = arith.constant 3 : index
    %8 = arith.index_cast %1 : i32 to index
    %9 = memref.load %arg2[%c3, %8] : memref<4x2xf32, #tpu.memory_space<smem>>
    %cst = arith.constant 1.000000e+00 : f32
    %10 = arith.minimumf %5, %cst : f32
    %c0_0 = arith.constant 0 : index
    %c0_1 = arith.constant 0 : index
    %c0_2 = arith.constant 0 : index
    %c0_3 = arith.constant 0 : index
    %11 = vector.load %arg3[%c0_0, %c0_1, %c0_2, %c0_3] : memref<1x3x8x128xf32, #tpu.memory_space<vmem>>, vector<1x3x8x128xf32>
    %12 = vector.shape_cast %11 : vector<1x3x8x128xf32> to vector<3x8x128xf32>
    %13 = vector.broadcast %3 : f32 to vector<3x8x128xf32>
    %14 = arith.addf %12, %13 : vector<3x8x128xf32>
    %15 = vector.broadcast %5 : f32 to vector<3x8x128xf32>
    %16 = arith.mulf %14, %15 : vector<3x8x128xf32>
    %cst_4 = arith.constant 0.000000e+00 : f32
    %17 = vector.broadcast %cst_4 : f32 to vector<3x8x128xf32>
    %18 = arith.maximumf %17, %16 : vector<3x8x128xf32>
    %19 = vector.broadcast %10 : f32 to vector<3x8x128xf32>
    %20 = arith.minimumf %19, %18 : vector<3x8x128xf32>
    %21 = vector.extract_strided_slice %20 {offsets = [0, 0, 0], sizes = [1, 8, 128], strides = [1, 1, 1]} : vector<3x8x128xf32> to vector<1x8x128xf32>
    %22 = vector.shape_cast %21 : vector<1x8x128xf32> to vector<8x128xf32>
    %23 = vector.extract_strided_slice %20 {offsets = [1, 0, 0], sizes = [1, 8, 128], strides = [1, 1, 1]} : vector<3x8x128xf32> to vector<1x8x128xf32>
    %24 = vector.shape_cast %23 : vector<1x8x128xf32> to vector<8x128xf32>
    %25 = vector.extract_strided_slice %20 {offsets = [2, 0, 0], sizes = [1, 8, 128], strides = [1, 1, 1]} : vector<3x8x128xf32> to vector<1x8x128xf32>
    %26 = vector.shape_cast %25 : vector<1x8x128xf32> to vector<8x128xf32>
    %27 = arith.maximumf %22, %24 : vector<8x128xf32>
    %28 = arith.maximumf %27, %26 : vector<8x128xf32>
    %29 = arith.minimumf %22, %24 : vector<8x128xf32>
    %30 = arith.minimumf %29, %26 : vector<8x128xf32>
    %31 = arith.subf %28, %30 : vector<8x128xf32>
    %cst_5 = arith.constant 9.99999993E-9 : f32
    %32 = vector.broadcast %cst_5 : f32 to vector<8x128xf32>
    %33 = arith.maximumf %28, %32 : vector<8x128xf32>
    %34 = tpu.reciprocal %33 {approx = true} : vector<8x128xf32> -> vector<8x128xf32>
    %35 = arith.mulf %31, %34 : vector<8x128xf32>
    %cst_6 = arith.constant 0.000000e+00 : f32
    %36 = vector.broadcast %cst_6 : f32 to vector<8x128xf32>
    %37 = arith.cmpf ogt, %31, %36 : vector<8x128xf32>
    %cst_7 = arith.constant 1.000000e+00 : f32
    %38 = vector.broadcast %cst_7 : f32 to vector<8x128xf32>
    %39 = arith.select %37, %31, %38 : vector<8x128xi1>, vector<8x128xf32>
    %40 = tpu.reciprocal %39 {approx = true} : vector<8x128xf32> -> vector<8x128xf32>
    %41 = arith.cmpf oeq, %28, %22 : vector<8x128xf32>
    %42 = arith.cmpf oeq, %28, %24 : vector<8x128xf32>
    %43 = arith.subf %24, %26 : vector<8x128xf32>
    %44 = arith.subf %26, %22 : vector<8x128xf32>
    %45 = arith.subf %22, %24 : vector<8x128xf32>
    %46 = arith.select %42, %44, %45 : vector<8x128xi1>, vector<8x128xf32>
    %47 = arith.select %41, %43, %46 : vector<8x128xi1>, vector<8x128xf32>
    %cst_8 = arith.constant 2.000000e+00 : f32
    %cst_9 = arith.constant 4.000000e+00 : f32
    %48 = vector.broadcast %cst_8 : f32 to vector<8x128xf32>
    %49 = vector.broadcast %cst_9 : f32 to vector<8x128xf32>
    %50 = arith.select %42, %48, %49 : vector<8x128xi1>, vector<8x128xf32>
    %cst_10 = arith.constant 0.000000e+00 : f32
    %51 = vector.broadcast %cst_10 : f32 to vector<8x128xf32>
    %52 = arith.select %41, %51, %50 : vector<8x128xi1>, vector<8x128xf32>
    %53 = arith.mulf %47, %40 : vector<8x128xf32>
    %54 = arith.addf %53, %52 : vector<8x128xf32>
    %55 = vector.broadcast %7 : f32 to vector<8x128xf32>
    %56 = arith.mulf %35, %55 : vector<8x128xf32>
    %cst_11 = arith.constant 0.000000e+00 : f32
    %cst_12 = arith.constant 1.000000e+00 : f32
    %57 = vector.broadcast %cst_11 : f32 to vector<8x128xf32>
    %58 = arith.maximumf %57, %56 : vector<8x128xf32>
    %59 = vector.broadcast %cst_12 : f32 to vector<8x128xf32>
    %60 = arith.minimumf %59, %58 : vector<8x128xf32>
    %cst_13 = arith.constant 0.954929649 : f32
    %61 = arith.mulf %9, %cst_13 : f32
    %62 = vector.broadcast %61 : f32 to vector<8x128xf32>
    %63 = arith.addf %54, %62 : vector<8x128xf32>
    %cst_14 = arith.constant 0.000000e+00 : f32
    %64 = vector.broadcast %cst_14 : f32 to vector<8x128xf32>
    %65 = arith.cmpf olt, %63, %64 : vector<8x128xf32>
    %cst_15 = arith.constant 6.000000e+00 : f32
    %66 = vector.broadcast %cst_15 : f32 to vector<8x128xf32>
    %67 = arith.addf %63, %66 : vector<8x128xf32>
    %68 = arith.select %65, %67, %63 : vector<8x128xi1>, vector<8x128xf32>
    %cst_16 = arith.constant 6.000000e+00 : f32
    %69 = vector.broadcast %cst_16 : f32 to vector<8x128xf32>
    %70 = arith.cmpf oge, %68, %69 : vector<8x128xf32>
    %cst_17 = arith.constant 6.000000e+00 : f32
    %71 = vector.broadcast %cst_17 : f32 to vector<8x128xf32>
    %72 = arith.subf %68, %71 : vector<8x128xf32>
    %73 = arith.select %70, %72, %68 : vector<8x128xi1>, vector<8x128xf32>
    %74 = arith.mulf %28, %60 : vector<8x128xf32>
    %cst_18 = arith.constant 5.000000e+00 : f32
    %75 = vector.broadcast %cst_18 : f32 to vector<8x128xf32>
    %76 = arith.addf %73, %75 : vector<8x128xf32>
    %cst_19 = arith.constant 6.000000e+00 : f32
    %77 = vector.broadcast %cst_19 : f32 to vector<8x128xf32>
    %78 = arith.cmpf oge, %76, %77 : vector<8x128xf32>
    %cst_20 = arith.constant 6.000000e+00 : f32
    %79 = vector.broadcast %cst_20 : f32 to vector<8x128xf32>
    %80 = arith.subf %76, %79 : vector<8x128xf32>
    %81 = arith.select %78, %80, %76 : vector<8x128xi1>, vector<8x128xf32>
    %cst_21 = arith.constant 4.000000e+00 : f32
    %82 = vector.broadcast %cst_21 : f32 to vector<8x128xf32>
    %83 = arith.subf %82, %81 : vector<8x128xf32>
    %84 = arith.minimumf %81, %83 : vector<8x128xf32>
    %cst_22 = arith.constant 0.000000e+00 : f32
    %cst_23 = arith.constant 1.000000e+00 : f32
    %85 = vector.broadcast %cst_22 : f32 to vector<8x128xf32>
    %86 = arith.maximumf %85, %84 : vector<8x128xf32>
    %87 = vector.broadcast %cst_23 : f32 to vector<8x128xf32>
    %88 = arith.minimumf %87, %86 : vector<8x128xf32>
    %89 = arith.mulf %74, %88 : vector<8x128xf32>
    %90 = arith.subf %28, %89 : vector<8x128xf32>
    %c0_24 = arith.constant 0 : index
    %c0_25 = arith.constant 0 : index
    %c0_26 = arith.constant 0 : index
    %c0_27 = arith.constant 0 : index
    %91 = vector.load %arg4[%c0_24, %c0_25, %c0_26, %c0_27] : memref<1x3x8x128xf32, #tpu.memory_space<vmem>>, vector<1x1x8x128xf32>
    %92 = vector.shape_cast %91 : vector<1x1x8x128xf32> to vector<8x128xf32>
    %93 = vector.shape_cast %90 : vector<8x128xf32> to vector<1x1x8x128xf32>
    tpu.vector_store %arg4[%c0_24, %c0_25, %c0_26, %c0_27], %93 {strides = array<i32>} : memref<1x3x8x128xf32, #tpu.memory_space<vmem>>, vector<1x1x8x128xf32>,
    %cst_28 = arith.constant 3.000000e+00 : f32
    %94 = vector.broadcast %cst_28 : f32 to vector<8x128xf32>
    %95 = arith.addf %73, %94 : vector<8x128xf32>
    %cst_29 = arith.constant 6.000000e+00 : f32
    %96 = vector.broadcast %cst_29 : f32 to vector<8x128xf32>
    %97 = arith.cmpf oge, %95, %96 : vector<8x128xf32>
    %cst_30 = arith.constant 6.000000e+00 : f32
    %98 = vector.broadcast %cst_30 : f32 to vector<8x128xf32>
    %99 = arith.subf %95, %98 : vector<8x128xf32>
    %100 = arith.select %97, %99, %95 : vector<8x128xi1>, vector<8x128xf32>
    %cst_31 = arith.constant 4.000000e+00 : f32
    %101 = vector.broadcast %cst_31 : f32 to vector<8x128xf32>
    %102 = arith.subf %101, %100 : vector<8x128xf32>
    %103 = arith.minimumf %100, %102 : vector<8x128xf32>
    %cst_32 = arith.constant 0.000000e+00 : f32
    %cst_33 = arith.constant 1.000000e+00 : f32
    %104 = vector.broadcast %cst_32 : f32 to vector<8x128xf32>
    %105 = arith.maximumf %104, %103 : vector<8x128xf32>
    %106 = vector.broadcast %cst_33 : f32 to vector<8x128xf32>
    %107 = arith.minimumf %106, %105 : vector<8x128xf32>
    %108 = arith.mulf %74, %107 : vector<8x128xf32>
    %109 = arith.subf %28, %108 : vector<8x128xf32>
    %c0_34 = arith.constant 0 : index
    %c1_35 = arith.constant 1 : index
    %c0_36 = arith.constant 0 : index
    %c0_37 = arith.constant 0 : index
    %110 = vector.load %arg4[%c0_34, %c1_35, %c0_36, %c0_37] : memref<1x3x8x128xf32, #tpu.memory_space<vmem>>, vector<1x1x8x128xf32>
    %111 = vector.shape_cast %110 : vector<1x1x8x128xf32> to vector<8x128xf32>
    %112 = vector.shape_cast %109 : vector<8x128xf32> to vector<1x1x8x128xf32>
    tpu.vector_store %arg4[%c0_34, %c1_35, %c0_36, %c0_37], %112 {strides = array<i32>} : memref<1x3x8x128xf32, #tpu.memory_space<vmem>>, vector<1x1x8x128xf32>,
    %cst_38 = arith.constant 1.000000e+00 : f32
    %113 = vector.broadcast %cst_38 : f32 to vector<8x128xf32>
    %114 = arith.addf %73, %113 : vector<8x128xf32>
    %cst_39 = arith.constant 6.000000e+00 : f32
    %115 = vector.broadcast %cst_39 : f32 to vector<8x128xf32>
    %116 = arith.cmpf oge, %114, %115 : vector<8x128xf32>
    %cst_40 = arith.constant 6.000000e+00 : f32
    %117 = vector.broadcast %cst_40 : f32 to vector<8x128xf32>
    %118 = arith.subf %114, %117 : vector<8x128xf32>
    %119 = arith.select %116, %118, %114 : vector<8x128xi1>, vector<8x128xf32>
    %cst_41 = arith.constant 4.000000e+00 : f32
    %120 = vector.broadcast %cst_41 : f32 to vector<8x128xf32>
    %121 = arith.subf %120, %119 : vector<8x128xf32>
    %122 = arith.minimumf %119, %121 : vector<8x128xf32>
    %cst_42 = arith.constant 0.000000e+00 : f32
    %cst_43 = arith.constant 1.000000e+00 : f32
    %123 = vector.broadcast %cst_42 : f32 to vector<8x128xf32>
    %124 = arith.maximumf %123, %122 : vector<8x128xf32>
    %125 = vector.broadcast %cst_43 : f32 to vector<8x128xf32>
    %126 = arith.minimumf %125, %124 : vector<8x128xf32>
    %127 = arith.mulf %74, %126 : vector<8x128xf32>
    %128 = arith.subf %28, %127 : vector<8x128xf32>
    %c0_44 = arith.constant 0 : index
    %c2_45 = arith.constant 2 : index
    %c0_46 = arith.constant 0 : index
    %c0_47 = arith.constant 0 : index
    %129 = vector.load %arg4[%c0_44, %c2_45, %c0_46, %c0_47] : memref<1x3x8x128xf32, #tpu.memory_space<vmem>>, vector<1x1x8x128xf32>
    %130 = vector.shape_cast %129 : vector<1x1x8x128xf32> to vector<8x128xf32>
    %131 = vector.shape_cast %128 : vector<8x128xf32> to vector<1x1x8x128xf32>
    tpu.vector_store %arg4[%c0_44, %c2_45, %c0_46, %c0_47], %131 {strides = array<i32>} : memref<1x3x8x128xf32, #tpu.memory_space<vmem>>, vector<1x1x8x128xf32>,
    return
  }
  func.func @transform_0(%arg0: i32, %arg1: i32, %arg2: memref<4x2xf32, #tpu.memory_space<smem>>) -> (i32, i32, i32, i32) {
    %c0_i32 = arith.constant 0 : i32
    %c0_i32_0 = arith.constant 0 : i32
    %c0_i32_1 = arith.constant 0 : i32
    return %arg0, %c0_i32, %arg1, %c0_i32_0 : i32, i32, i32, i32
  }
  func.func @transform_1(%arg0: i32, %arg1: i32, %arg2: memref<4x2xf32, #tpu.memory_space<smem>>) -> (i32, i32, i32, i32) {
    %c0_i32 = arith.constant 0 : i32
    %c0_i32_0 = arith.constant 0 : i32
    %c0_i32_1 = arith.constant 0 : i32
    return %arg0, %c0_i32, %arg1, %c0_i32_0 : i32, i32, i32, i32
  }
}

</mosaic_0001>

<bundles_post_ra>
// kernel: color_jitter.1
= control target key start
LH: loop header
LB: loop body
LE: loop exit
PB: predicated region body
PF: predicated region fallthrough
CT: control target
= control target key end

     0   :  { %s520_s0 = inlined_call_operand.vmem [shape: f32[4,2], index: 0, kind: input, shape index: {}]   ;;  %s521_s1 = inlined_call_operand.vmem [shape: f32[2,3,8,128], index: 1, kind: input, shape index: {}]   ;;  %s522_s2 = inlined_call_operand.vmem [shape: f32[2,3,8,128], index: 2, kind: output, shape index: {}]  }
   0x1   :  { %s7_s11 = sshll.u32 %s520_s0, 4  ;;  %s8_s11 = int_to_ptr.vmem [resolvable:$true] %s7_s11 }
   0x2   :  { %s401_s12 = scalar_lea.vmem %s8_s11, 64  ;;  %p406_p1 = scmp.lt.s32.totalorder %s8_s11, %s8_s11 }
   0x3   :  { %p402_p0 = scmp.ne.s32.totalorder %s8_s11, %s401_s12  ;;  %p407_p2 = scmp.lt.s32.totalorder %s401_s12, %s401_s12 }
   0x5   :  { %p408_p3 = por %p407_p2, %p406_p1 }
   0x7   :  { %p409_p4 = pnand %p408_p3, %p402_p0 }
   0x9   :  { %412 = shalt.err (!%p409_p4)  }
   0xa   :  { %s439_s13 = smov [#allocation3]  }
   0xb   :  { %10 = dma.vmem_to_smem %s8_s11, 64, %s439_s13, [#allocation2] }
   0xc   :  { %425 = dma.done.wait [#allocation2], 64 }
   0xd   :  { %426 = vsyncadd [#allocation2], 4294967232 }
   0xe   :  { %12 = sfence }
   0xf   :  { %s460_s14 = smov 0   ;;  %s462_s15 = smov 0  }
  0x10   :  { %s464_s16 = smov 0  }
  0x11 LB: > { %s30_s0 = sadd.s32 1, %s433_s15  ;;  %p349_p5 = scmp.ge.s32.totalorder %s437_s16, 1  ;;  %s437_s16 = sphi %s464_s16, %s18_s16   ;;  %s433_s15 = sphi %s462_s15, %s524_s15   ;;  %s429_s14 = sphi %s460_s14, %s523_s14  }
  0x12   : > { %p32_p6 = scmp.ge.s32.totalorder %s30_s0, 2  ;;  %p113_p7 = scmp.lt.s32.totalorder %s437_s16, 3 }
  0x14   : > { %s526_s0 = smov (%p32_p6, %s30_s0), 0  ;;  %p114_p8 = pnand %p349_p5, %p113_p7 }
  0x15   : > { %p139_p9 = scmp.lt.s32.totalorder (!%p114_p8), %s429_s14, 1  ;;  %s155_s17 = sld [smem:[#allocation3 + %s429_s14]] (!%p114_p8)  ;;  %v441_v29 = vmov (!%p114_p8), 4.0  }
  0x16   : > { %117 = sbr.rel (%p114_p8) target bundleno = 92 (0x5c), region = 24  ;;  %s156_s18 = sshra.s32 (!%p114_p8), %s429_s14, 7 }
  0x17   : > { %s478_s19 = sand.u32 (!%p114_p8), 127, %s429_s14  ;;  %s482_s20 = sshll.u32 (!%p114_p8), %s156_s18, 7 }
  0x18   : > { %s364_s22 = sadd.s32 (!%p114_p8), 128, %s482_s20  ;;  %s440_s28 = smov (!%p114_p8), 1.0  }
  0x19   : > { %s162_s23 = sadd.s32 (!%p114_p8), %s364_s22, %s478_s19  ;;  %s368_s30 = sadd.s32 (!%p114_p8), 384, %s482_s20 }
  0x1a   : > { %s163_s27 = sld [smem:[#allocation3 + %s162_s23]] (!%p114_p8)  ;;  %s170_s3 = sadd.s32 (!%p114_p8), %s368_s30, %s478_s19 }
  0x1b   : > { %v176_v3 = vstv (!%p114_p8), %s155_s17  ;;  %s171_s4 = sld [smem:[#allocation3 + %s170_s3]] (!%p114_p8)  ;;  %s366_s5 = sadd.s32 (!%p114_p8), 256, %s482_s20 }
  0x1c   : > { %s166_s6 = sadd.s32 (!%p114_p8), %s366_s5, %s478_s19 }
  0x1d   : > { %s528_s14 = smov (!%p139_p9, %s429_s14), 1  ;;  %s167_s8 = sld [smem:[#allocation3 + %s166_s6]] }
  0x1e   : > { %s369_s21 = smul.u32 24, %s528_s14 }
  0x20   : > { %s146_s26 = scalar_lea.vmem %s521_s1, %s369_s21  ;;  %s172_s29 = smin.f32 %s440_s28, %s163_s27  ;;  %v180_v7 = vstv %s163_s27 }
  0x21   : > { %v173_v0 = vld [vmem:[%s146_s26] sm:$0xff]  ;;  %v174_v1 = vld [vmem:[%s146_s26 + $0x8] sm:$0xff]  ;;  %v175_v2 = vld [vmem:[%s146_s26 + $0x10] sm:$0xff]  ;;  %v187_v11 = vstv %s172_s29  ;;  %s217_s7 = smul.f32 0.95492965, %s171_s4  ;;  %s154_s11 = scalar_lea.vmem %s522_s2, %s369_s21 }
  0x22   : > { %v177_v4 = vadd.f32 %v176_v3, %v173_v0  ;;  %v178_v5 = vadd.f32 %v176_v3, %v174_v1  ;;  %v179_v6 = vadd.f32 %v176_v3, %v175_v2 }
  0x23   : > { %v218_v35 = vstv %s217_s7  ;;  %v213_v40 = vstv %s167_s8 }
  0x24   : > { %v181_v8 = vmul.f32 %v180_v7, %v177_v4  ;;  %v182_v9 = vmul.f32 %v180_v7, %v178_v5  ;;  %v183_v10 = vmul.f32 %v180_v7, %v179_v6 }
  0x26   : > { %v184_v12 = vmax.f32 %v181_v8, 0.0  ;;  %v185_v13 = vmax.f32 %v182_v9, 0.0  ;;  %v186_v14 = vmax.f32 %v183_v10, 0.0 }
  0x28   : > { %v188_v15 = vmin.f32 %v187_v11, %v184_v12  ;;  %v189_v16 = vmin.f32 %v187_v11, %v185_v13  ;;  %v190_v17 = vmin.f32 %v187_v11, %v186_v14 }
  0x2a   : > { %v191_v18 = vmax.f32 %v188_v15, %v189_v16  ;;  %v193_v19 = vmin.f32 %v188_v15, %v189_v16  ;;  %v205_v25 = vsub.f32 %v190_v17, %v188_v15  ;;  %v206_v26 = vsub.f32 %v188_v15, %v189_v16 }
  0x2b   : > { %v204_v27 = vsub.f32 %v189_v16, %v190_v17 }
  0x2c   : > { %v493_v20 = vmax.f32 %v191_v18, %v190_v17  ;;  %v194_v21 = vmin.f32 %v193_v19, %v190_v17 }
  0x2e   : > { %v195_v22 = vsub.f32 %v493_v20, %v194_v21  ;;  %v196_v23 = vmax.f32 %v493_v20, 1e-08  ;;  %vm203_vm1 = vcmp.eq.f32.partialorder %v493_v20, %v189_v16  ;;  %vm202_vm2 = vcmp.eq.f32.partialorder %v493_v20, %v188_v15 }
  0x2f   : > { %v207_v28 = vsel %vm203_vm1, %v205_v25, %v206_v26  ;;  %v209_v30 = vsel %vm203_vm1, 2.0, %v441_v29 }
  0x30   : > { %vm199_vm0 = vcmp.gt.f32.partialorder %v195_v22, 0.0  ;;  %v208_v31 = vsel %vm202_vm2, %v204_v27, %v207_v28  ;;  %v210_v33 = vsel %vm202_vm2, 0.0, %v209_v30 }
  0x31   : > { %v200_v24 = vsel %vm199_vm0, %v195_v22, 1.0 }
  0x32   : > { %397 = vrcp.f32 %v200_v24 }
  0x33   : > { %399 = vrcp.f32 %v196_v23 }
  0x3c   : > { %v398_v32 = vpop.eup %397 }
  0x3d   : > { %v211_v34 = vmul.f32 %v398_v32, %v208_v31  ;;  %v400_v36 = vpop.eup %399 }
  0x3e   : > { %v198_v39 = vmul.f32 %v400_v36, %v195_v22 }
  0x3f   : > { %v212_v37 = vadd.f32 %v211_v34, %v210_v33 }
  0x40   : > { %v214_v43 = vmul.f32 %v213_v40, %v198_v39 }
  0x41   : > { %v219_v38 = vadd.f32 %v218_v35, %v212_v37 }
  0x42   : > { %v215_v49 = vmax.f32 %v214_v43, 0.0 }
  0x43   : > { %vm220_vm3 = vcmp.lt.f32.partialorder %v219_v38, 0.0  ;;  %v221_v41 = vadd.f32 6.0, %v219_v38 }
  0x44   : > { %v216_v55 = vmin.f32 %v215_v49, 1.0 }
  0x45   : > { %v222_v42 = vsel %vm220_vm3, %v221_v41, %v219_v38 }
  0x46   : > { %vm223_vm4 = vcmp.ge.f32.partialorder %v222_v42, 6.0  ;;  %v355_v44 = vadd.f32 -6.0, %v222_v42  ;;  %v226_v63 = vmul.f32 %v216_v55, %v493_v20 }
  0x48   : > { %v225_v45 = vsel %vm223_vm4, %v355_v44, %v222_v42 }
  0x49   : > { %v227_v46 = vadd.f32 5.0, %v225_v45  ;;  %v238_v47 = vadd.f32 3.0, %v225_v45  ;;  %v250_v48 = vadd.f32 1.0, %v225_v45 }
  0x4b   : > { %vm228_vm5 = vcmp.ge.f32.partialorder %v227_v46, 6.0  ;;  %v356_v50 = vadd.f32 -6.0, %v227_v46  ;;  %vm239_vm6 = vcmp.ge.f32.partialorder %v238_v47, 6.0  ;;  %v357_v51 = vadd.f32 -6.0, %v238_v47 }
  0x4c   : > { %vm251_vm7 = vcmp.ge.f32.partialorder %v250_v48, 6.0  ;;  %v359_v52 = vadd.f32 -6.0, %v250_v48 }
  0x4d   : > { %v230_v53 = vsel %vm228_vm5, %v356_v50, %v227_v46  ;;  %v241_v54 = vsel %vm239_vm6, %v357_v51, %v238_v47 }
  0x4e   : > { %v231_v56 = vsub.f32 4.0, %v230_v53  ;;  %v242_v57 = vsub.f32 4.0, %v241_v54  ;;  %v253_v58 = vsel %vm251_vm7, %v359_v52, %v250_v48 }
  0x4f   : > { %v254_v59 = vsub.f32 4.0, %v253_v58 }
  0x50   : > { %v232_v60 = vmin.f32 %v230_v53, %v231_v56  ;;  %v243_v61 = vmin.f32 %v241_v54, %v242_v57 }
  0x51   : > { %v255_v62 = vmin.f32 %v253_v58, %v254_v59 }
  0x52   : > { %v233_v0 = vmax.f32 %v232_v60, 0.0  ;;  %v244_v1 = vmax.f32 %v243_v61, 0.0 }
  0x53   : > { %v256_v2 = vmax.f32 %v255_v62, 0.0 }
  0x54   : > { %v234_v3 = vmin.f32 %v233_v0, 1.0  ;;  %v245_v4 = vmin.f32 %v244_v1, 1.0 }
  0x55   : > { %v257_v5 = vmin.f32 %v256_v2, 1.0 }
  0x56   : > { %v235_v6 = vmul.f32 %v234_v3, %v226_v63  ;;  %v246_v7 = vmul.f32 %v245_v4, %v226_v63 }
  0x57   : > { %v258_v8 = vmul.f32 %v257_v5, %v226_v63 }
  0x58   : > { %v236_v9 = vsub.f32 %v493_v20, %v235_v6  ;;  %v247_v10 = vsub.f32 %v493_v20, %v246_v7 }
  0x59   : > { %v259_v11 = vsub.f32 %v493_v20, %v258_v8 }
  0x5a   : > { %237 = vst [vmem:[%s154_s11] sm:$0xff] %v236_v9  ;;  %358 = vst [vmem:[%s154_s11 + $0x8] sm:$0xff] %v247_v10 }
  0x5b   : > { %360 = vst [vmem:[%s154_s11 + $0x10] sm:$0xff] %v259_v11 }
  0x5c PF: > { %s18_s16 = sadd.s32 1, %s437_s16   ;;  %s523_s14 = smov %s433_s15 }
  0x5d   : > { %p15_p10 = scmp.ge.s32.totalorder %s18_s16, 4   ;;  %s524_s15 = smov %s526_s0 }
  0x5f   :  { %17 = sbr.rel (!%p15_p10) target bundleno = 17 (0x11), region = 56 }

</bundles_post_ra>
